<compile_context>
chip_gen: v5e
topology: v5e:2x2
jax: 0.10.0
libtpu: 0.0.40
codegen_flags: <defaults>
</compile_context>

<pallas_src>
import jax
import jax.numpy as jnp
from jax.experimental import pallas as pl
from jax.experimental.pallas import tpu as pltpu

_LANES = 128


def _silu_kernel(x_ref, o_ref):
    # x * sigmoid(x) == 0.5 * x * (tanh(0.5 * x) + 1); compute in f32.
    x = x_ref[...].astype(jnp.float32)
    o_ref[...] = (0.5 * x * (jnp.tanh(0.5 * x) + 1.0)).astype(o_ref.dtype)


def _silu_jnp(x):
    xf = x.astype(jnp.float32)
    return (0.5 * xf * (jnp.tanh(0.5 * xf) + 1.0)).astype(x.dtype)


def _default_block_bytes():
    """Per-generation block size: bigger blocks where default scoped VMEM allows."""
    try:
        kind = jax.devices()[0].device_kind.lower()
    except Exception:
        return 2 * 1024 * 1024
    if ("v6" in kind) or ("v7" in kind) or ("7x" in kind):
        # 4 MiB block -> 16 MiB double-buffered in+out; fits 32 MiB default scoped VMEM.
        return 4 * 1024 * 1024
    # v5e (and unknown): 2 MiB block -> 8 MiB footprint vs 16 MiB default scoped VMEM.
    return 2 * 1024 * 1024


def surrogate_silu(x, *, lane_width=1024, block_bytes=None, donate_input=False):
    """Elementwise SiLU via a Pallas TPU kernel. Accepts any shape/float dtype."""
    orig_shape = x.shape
    orig_dtype = x.dtype
    n = x.size
    if n == 0:
        return x

    itemsize = jnp.dtype(orig_dtype).itemsize

    # ---- Rare ragged path: n not a multiple of 128 lanes. ------------------
    # Kernel the aligned prefix, tiny tail (<128 elems) in plain jnp.  This
    # avoids a whole-array pad + slice (which would triple HBM traffic).
    if n % _LANES != 0:
        x_flat = x.reshape(-1)
        n_main = (n // _LANES) * _LANES
        if n_main == 0:
            return _silu_jnp(x_flat).reshape(orig_shape)
        y_main = surrogate_silu(
            x_flat[:n_main], lane_width=lane_width, block_bytes=block_bytes
        )
        y_tail = _silu_jnp(x_flat[n_main:])
        return jnp.concatenate([y_main, y_tail]).reshape(orig_shape)

    # ---- Lane-dense slab: W = largest multiple of 128 dividing n. ----------
    m = n // _LANES
    k = 1
    for cand in range(min(max(1, lane_width // _LANES), m), 0, -1):
        if m % cand == 0:
            k = cand
            break
    W = k * _LANES
    rows = n // W
    x2d = x.reshape(rows, W)  # contiguous reshape: no HBM copy pass

    # ---- Row tile: sublane-packing multiple, sized for ~block_bytes. -------
    sub = max(8, 32 // itemsize)  # 8 for f32, 16 for bf16/f16, 32 for 8-bit
    if block_bytes is None:
        block_bytes = _default_block_bytes()
    cap = max(sub, (block_bytes // (W * itemsize)) // sub * sub)

    if rows > cap:
        tr = cap  # grid >= 2 automatically
    else:
        # Whole slab fits in one block: still try to split into >= 2 grid
        # steps so both TensorCores (v7x megacore) get work.
        half = ((rows + 1) // 2 // sub) * sub
        tr = half if half >= sub else rows  # tr == rows -> single full block

    grid = (pl.cdiv(rows, tr),)

    extra = {}
    if donate_input:
        # Halves peak HBM footprint when the caller donates x (no traffic change).
        extra["input_output_aliases"] = {0: 0}

    y2d = pl.pallas_call(
        _silu_kernel,
        out_shape=jax.ShapeDtypeStruct((rows, W), orig_dtype),
        grid_spec=pltpu.PrefetchScalarGridSpec(
            num_scalar_prefetch=0,
            grid=grid,
            in_specs=[pl.BlockSpec((tr, W), lambda i: (i, 0))],
            out_specs=pl.BlockSpec((tr, W), lambda i: (i, 0)),
        ),
        compiler_params=pltpu.CompilerParams(
            dimension_semantics=("parallel",),
        ),
        **extra,
    )(x2d)

    return y2d.reshape(orig_shape)


if __name__ == "__main__":
    key = jax.random.PRNGKey(0)
    # NCHW input, matching PyTorch conv-style layout conventions.
    x = jax.random.normal(key, (2, 4, 16, 16), dtype=jnp.float32)

    y = surrogate_silu(x)
    jax.block_until_ready(y)

    # Reference check against plain JAX silu.
    y_ref = x * jax.nn.sigmoid(x)
    assert y.shape == x.shape and y.dtype == x.dtype
    assert jnp.allclose(y, y_ref, atol=1e-5, rtol=1e-5)

    print("KERNEL_OK")
</pallas_src>

<mosaic_0001>
module attributes {stable_mosaic.version = 11 : i64} {
  func.func @_silu_kernel(%arg0: i32, %arg1: memref<2x1024xf32, #tpu.memory_space<vmem>>, %arg2: memref<2x1024xf32, #tpu.memory_space<vmem>>) attributes {dimension_semantics = [#tpu.dimension_semantics<parallel>], iteration_bounds = array<i64: 1>, scalar_prefetch = 0 : i64, scratch_operands = 0 : i64, tpu.core_type = #tpu.core_type<tc>, window_params = [{transform_indices = @transform_0, window_bounds = array<i64: 2, 1024>}, {transform_indices = @transform_1, window_bounds = array<i64: 2, 1024>}]} {
    %c0 = arith.constant 0 : index
    %c0_0 = arith.constant 0 : index
    %0 = vector.load %arg1[%c0, %c0_0] : memref<2x1024xf32, #tpu.memory_space<vmem>>, vector<2x1024xf32>
    %cst = arith.constant 5.000000e-01 : f32
    %1 = vector.broadcast %cst : f32 to vector<2x1024xf32>
    %2 = arith.mulf %1, %0 : vector<2x1024xf32>
    %cst_1 = arith.constant 5.000000e-01 : f32
    %3 = vector.broadcast %cst_1 : f32 to vector<2x1024xf32>
    %4 = arith.mulf %3, %0 : vector<2x1024xf32>
    %5 = math.tanh %4 : vector<2x1024xf32>
    %cst_2 = arith.constant 1.000000e+00 : f32
    %6 = vector.broadcast %cst_2 : f32 to vector<2x1024xf32>
    %7 = arith.addf %5, %6 : vector<2x1024xf32>
    %8 = arith.mulf %2, %7 : vector<2x1024xf32>
    %c0_3 = arith.constant 0 : index
    %c0_4 = arith.constant 0 : index
    %9 = vector.load %arg2[%c0_3, %c0_4] : memref<2x1024xf32, #tpu.memory_space<vmem>>, vector<2x1024xf32>
    tpu.vector_store %arg2[%c0_3, %c0_4], %8 {strides = array<i32>} : memref<2x1024xf32, #tpu.memory_space<vmem>>, vector<2x1024xf32>,
    return
  }
  func.func @transform_0(%arg0: i32) -> (i32, i32) {
    %c0_i32 = arith.constant 0 : i32
    %c0_i32_0 = arith.constant 0 : i32
    return %arg0, %c0_i32 : i32, i32
  }
  func.func @transform_1(%arg0: i32) -> (i32, i32) {
    %c0_i32 = arith.constant 0 : i32
    %c0_i32_0 = arith.constant 0 : i32
    return %arg0, %c0_i32 : i32, i32
  }
}

</mosaic_0001>

<bundles_post_ra>
// kernel: tpu_custom_call.1
= control target key start
LH: loop header
LB: loop body
LE: loop exit
PB: predicated region body
PF: predicated region fallthrough
CT: control target
= control target key end

     0   :  { %6 = vsyncpa [#allocation3], 0  ;;  %s128_s0 = inlined_call_operand.hbm [shape: f32[2,1024], index: 0, kind: input, shape index: {}]   ;;  %s129_s1 = inlined_call_operand.hbm [shape: f32[2,1024], index: 1, kind: output, shape index: {}]  }
   0x1   :  { %7 = vsyncpa [#allocation4], 0  ;;  %s13_s8 = sshll.u32 %s128_s0, 4  ;;  %s110_s9 = smov [#allocation2]   ;;  %s14_s8 = int_to_ptr.hbm [resolvable:$true] %s13_s8 }
   0x2   :  { %s15_s10 = sshll.u32 %s110_s9, 4  ;;  %s16_s10 = int_to_ptr.vmem [resolvable:$true] %s15_s10 }
   0x3   :  { %18 = dma.hbm_to_vmem [thread:$0]  %s14_s8, 256, %s16_s10, [#allocation3]  }
   0x4   :  { %106 = dma.done.wait [#allocation3], 256  }
   0x5   :  { %107 = vsyncadd [#allocation3], 4294967040  ;;  %v23_v0 = vld [vmem:[#allocation2] sm:$0xff]  ;;  %v24_v1 = vld [vmem:[#allocation2 + $0x8] sm:$0xff]  ;;  %s111_s11 = smov [#allocation5]   ;;  %s42_s14 = sshll.u32 %s129_s1, 4  ;;  %s43_s14 = int_to_ptr.hbm [resolvable:$true] %s42_s14 }
   0x6   :  { %v25_v2 = vmul.f32 0.5, %v23_v0  ;;  %v26_v3 = vmul.f32 0.5, %v24_v1  ;;  %s40_s12 = sshll.u32 %s111_s11, 4  ;;  %s41_s12 = int_to_ptr.vmem [resolvable:$true] %s40_s12 }
   0x8   :  { %54 = vtanh.f32 %v25_v2 }
   0x9   :  { %56 = vtanh.f32 %v26_v3 }
   0xe   :  { %v55_v4 = vpop.eup %54 }
   0xf   :  { %v57_v5 = vpop.eup %56  ;;  %v29_v6 = vadd.f32 1.0, %v55_v4 }
  0x10   :  { %v30_v7 = vadd.f32 1.0, %v57_v5 }
  0x11   :  { %v31_v8 = vmul.f32 %v29_v6, %v25_v2 }
  0x12   :  { %v32_v9 = vmul.f32 %v30_v7, %v26_v3 }
  0x13   :  { %33 = vst [vmem:[#allocation5] sm:$0xff] %v31_v8 }
  0x14   :  { %34 = vst [vmem:[#allocation5 + $0x8] sm:$0xff] %v32_v9 }
  0x15   :  { %45 = dma.vmem_to_hbm [thread:$0]  %s41_s12, 256, %s43_s14, [#allocation4]  }
  0x16   :  { %108 = dma.done.wait [#allocation4], 256  }
  0x17   :  { %109 = vsyncadd [#allocation4], 4294967040 }
  0x18   :  { %50 = vsyncpa [#allocation3], 1 }
  0x19   :  { %51 = vsyncpa [#allocation4], 1 }

</bundles_post_ra>
